<compile_context>
chip_gen: v7x
topology: tpu7x:2x2x1
jax: 0.10.0
libtpu: 0.0.40
codegen_flags: <defaults>
</compile_context>

<pallas_src>
import jax
import jax.numpy as jnp
from jax.experimental import pallas as pl
from jax.experimental.pallas import tpu as pltpu

_LANE = 128


def _evidence_kernel(x_ref, w1_ref, b1_ref, w2_ref, b2_ref, w3_ref, b3_ref,
                     out_ref):
    # TODO(synk): nn.Dropout(0.1) omitted (inference-mode identity).
    # Layer 0: Linear + ReLU. x arrives unpadded f32; bf16 cast is a free VPU
    # op under the DMA-bound schedule. K=32 is fine for the MXU.
    x = x_ref[...].astype(jnp.bfloat16)
    h = jnp.dot(x, w1_ref[...], preferred_element_type=jnp.float32)
    h = jnp.maximum(h + b1_ref[...], 0.0)

    # Layer 1: Linear + ReLU (bf16 operands into the MXU, f32 accumulate).
    h = jnp.dot(h.astype(jnp.bfloat16), w2_ref[...],
                preferred_element_type=jnp.float32)
    h = jnp.maximum(h + b2_ref[...], 0.0)

    # Evidence head: Linear + softplus, emitted at the real class width.
    h = jnp.dot(h.astype(jnp.bfloat16), w3_ref[...],
                preferred_element_type=jnp.float32)
    out_ref[...] = jax.nn.softplus(h + b3_ref[...]).astype(out_ref.dtype)


def _pad2(a, rows, cols):
    """Zero-pad a 2-D array up to (rows, cols)."""
    return jnp.pad(a, ((0, rows - a.shape[0]), (0, cols - a.shape[1])))


def _round_up(n, m):
    return ((n + m - 1) // m) * m


def evidence_collector_forward(x, params, *, tb=2048):
    """Fused forward pass. params = (w1, b1, w2, b2, w3, b3), weights [in, out]."""
    w1, b1, w2, b2, w3, b3 = params
    batch, d_in = x.shape
    d_h1 = w1.shape[1]
    d_h2 = w2.shape[1]
    num_classes = w3.shape[1]

    # Hidden dims padded to 128 lanes only (keeps intermediate tiles lane-full;
    # do NOT pad to 256 -- this op is bandwidth/overhead bound, not MXU bound).
    d_h1_p = _round_up(d_h1, _LANE)
    d_h2_p = _round_up(d_h2, _LANE)

    # Batch tiling: TB a multiple of 8; cap it so the grid keeps >= 2 steps
    # when the batch is large enough (v7x has 2 TensorCores).
    b8 = _round_up(batch, 8)
    TB = min(max(8, _round_up(tb, 8)), b8)
    if b8 >= 16 and TB > (b8 + 1) // 2:
        TB = _round_up((b8 + 1) // 2, 8)
    bp = _round_up(b8, TB)
    grid = (bp // TB,)

    # x stays f32 and unpadded in the feature dim; only pad rows if needed so
    # every grid step sees a full tile.
    x_in = x if bp == batch else jnp.pad(x, ((0, bp - batch), (0, 0)))

    # Weights bf16 (MXU-native), biases f32 (added post-accumulate). These are
    # tiny, one-time conversions outside the hot path. The final layer stays
    # at the real class width so the output is only num_classes wide.
    w1p = _pad2(w1, d_in, d_h1_p).astype(jnp.bfloat16)
    w2p = _pad2(w2, d_h1_p, d_h2_p).astype(jnp.bfloat16)
    w3p = _pad2(w3, d_h2_p, num_classes).astype(jnp.bfloat16)
    b1p = _pad2(b1, 1, d_h1_p).astype(jnp.float32)
    b2p = _pad2(b2, 1, d_h2_p).astype(jnp.float32)
    b3p = b3.astype(jnp.float32).reshape(1, num_classes)

    # Realistic (unpadded) cost estimate for XLA scheduling.
    flops = 2 * batch * (d_in * d_h1 + d_h1 * d_h2 + d_h2 * num_classes)
    bytes_accessed = (batch * d_in * 4 + batch * num_classes * 4 +
                      (d_in * d_h1 + d_h1 * d_h2 + d_h2 * num_classes) * 2 +
                      (d_h1 + d_h2 + num_classes) * 4)
    cost = pl.CostEstimate(flops=flops,
                           transcendentals=batch * num_classes,
                           bytes_accessed=bytes_accessed)

    out = pl.pallas_call(
        _evidence_kernel,
        out_shape=jax.ShapeDtypeStruct((bp, num_classes), jnp.float32),
        grid_spec=pl.GridSpec(
            grid=grid,
            in_specs=[
                # Batch-tiled activations (last dim = full array dim -> legal).
                pl.BlockSpec((TB, d_in), lambda i: (i, 0)),
                # Weights/biases: same block every step -> VMEM-resident.
                pl.BlockSpec((d_in, d_h1_p), lambda i: (0, 0)),
                pl.BlockSpec((1, d_h1_p), lambda i: (0, 0)),
                pl.BlockSpec((d_h1_p, d_h2_p), lambda i: (0, 0)),
                pl.BlockSpec((1, d_h2_p), lambda i: (0, 0)),
                pl.BlockSpec((d_h2_p, num_classes), lambda i: (0, 0)),
                pl.BlockSpec((1, num_classes), lambda i: (0, 0)),
            ],
            out_specs=pl.BlockSpec((TB, num_classes), lambda i: (i, 0)),
        ),
        compiler_params=pltpu.CompilerParams(
            dimension_semantics=("parallel",),
        ),
        cost_estimate=cost,
    )(x_in, w1p, b1p, w2p, b2p, w3p, b3p)

    # Drop batch padding only (output already has the real class width).
    return out if bp == batch else out[:batch]


def init_params(key, dims, num_classes):
    """Deterministic init matching nn.Linear shapes (weights pre-transposed
    to [in_features, out_features])."""
    sizes = list(dims) + [num_classes]
    params = []
    for i in range(len(sizes) - 1):
        fan_in, fan_out = sizes[i], sizes[i + 1]
        key, kw, kb = jax.random.split(key, 3)
        bound = 1.0 / jnp.sqrt(fan_in)
        w = jax.random.uniform(kw, (fan_in, fan_out), jnp.float32, -bound, bound)
        b = jax.random.uniform(kb, (1, fan_out), jnp.float32, -bound, bound)
        params += [w, b]
    return tuple(params)


if __name__ == "__main__":
    dims = (32, 64, 32)          # dims[0] = input feature size
    num_classes = 8
    batch = 8

    key = jax.random.PRNGKey(0)
    key, kx = jax.random.split(key)
    x = jax.random.normal(kx, (batch, dims[0]), jnp.float32)
    params = init_params(key, dims, num_classes)

    out = evidence_collector_forward(x, params)
    jax.block_until_ready(out)

    # Reference check in plain JAX (eval-mode dropout = identity). Tolerance is
    # loosened because the kernel uses bf16 matmul operands (f32 accumulation).
    w1, b1, w2, b2, w3, b3 = params
    h = jnp.maximum(x @ w1 + b1, 0.0)
    h = jnp.maximum(h @ w2 + b2, 0.0)
    ref = jax.nn.softplus(h @ w3 + b3)
    assert out.shape == (batch, num_classes)
    assert jnp.allclose(out, ref, atol=3e-2, rtol=3e-2), (
        float(jnp.max(jnp.abs(out - ref))))

    print("KERNEL_OK")
</pallas_src>

<mosaic_0001>
module attributes {stable_mosaic.version = 11 : i64} {
  func.func @_evidence_kernel(%arg0: i32, %arg1: memref<8x32xf32, #tpu.memory_space<vmem>>, %arg2: memref<32x128xbf16, #tpu.memory_space<vmem>>, %arg3: memref<1x128xf32, #tpu.memory_space<vmem>>, %arg4: memref<128x128xbf16, #tpu.memory_space<vmem>>, %arg5: memref<1x128xf32, #tpu.memory_space<vmem>>, %arg6: memref<128x8xbf16, #tpu.memory_space<vmem>>, %arg7: memref<1x8xf32, #tpu.memory_space<vmem>>, %arg8: memref<8x8xf32, #tpu.memory_space<vmem>>) attributes {dimension_semantics = [#tpu.dimension_semantics<parallel>], iteration_bounds = array<i64: 1>, scalar_prefetch = 0 : i64, scratch_operands = 0 : i64, tpu.core_type = #tpu.core_type<tc>, window_params = [{transform_indices = @transform_0, window_bounds = array<i64: 8, 32>}, {pipeline_mode = #tpu.pipeline_mode<synchronous>, transform_indices = @transform_1, window_bounds = array<i64: 32, 128>}, {pipeline_mode = #tpu.pipeline_mode<synchronous>, transform_indices = @transform_2, window_bounds = array<i64: 1, 128>}, {pipeline_mode = #tpu.pipeline_mode<synchronous>, transform_indices = @transform_3, window_bounds = array<i64: 128, 128>}, {pipeline_mode = #tpu.pipeline_mode<synchronous>, transform_indices = @transform_4, window_bounds = array<i64: 1, 128>}, {pipeline_mode = #tpu.pipeline_mode<synchronous>, transform_indices = @transform_5, window_bounds = array<i64: 128, 8>}, {pipeline_mode = #tpu.pipeline_mode<synchronous>, transform_indices = @transform_6, window_bounds = array<i64: 1, 8>}, {transform_indices = @transform_7, window_bounds = array<i64: 8, 8>}]} {
    %c0 = arith.constant 0 : index
    %c0_0 = arith.constant 0 : index
    %0 = vector.load %arg1[%c0, %c0_0] : memref<8x32xf32, #tpu.memory_space<vmem>>, vector<8x32xf32>
    %1 = arith.truncf %0 : vector<8x32xf32> to vector<8x32xbf16>
    %c0_1 = arith.constant 0 : index
    %c0_2 = arith.constant 0 : index
    %2 = vector.load %arg2[%c0_1, %c0_2] : memref<32x128xbf16, #tpu.memory_space<vmem>>, vector<32x128xbf16>
    %cst = arith.constant dense<0.000000e+00> : vector<8x128xf32>
    %3 = tpu.matmul %1, %2, %cst {dimension_numbers = #tpu.dot_dimension_numbers<[1], [0], [0], [1], [0, 0, 1, 1], [], []>} : vector<8x32xbf16>, vector<32x128xbf16>, vector<8x128xf32> -> vector<8x128xf32>
    %c0_3 = arith.constant 0 : index
    %c0_4 = arith.constant 0 : index
    %4 = vector.load %arg3[%c0_3, %c0_4] : memref<1x128xf32, #tpu.memory_space<vmem>>, vector<1x128xf32>
    %5 = vector.broadcast %4 : vector<1x128xf32> to vector<8x128xf32>
    %6 = arith.addf %3, %5 : vector<8x128xf32>
    %cst_5 = arith.constant 0.000000e+00 : f32
    %7 = vector.broadcast %cst_5 : f32 to vector<8x128xf32>
    %8 = arith.maximumf %6, %7 : vector<8x128xf32>
    %9 = arith.truncf %8 : vector<8x128xf32> to vector<8x128xbf16>
    %c0_6 = arith.constant 0 : index
    %c0_7 = arith.constant 0 : index
    %10 = vector.load %arg4[%c0_6, %c0_7] : memref<128x128xbf16, #tpu.memory_space<vmem>>, vector<128x128xbf16>
    %cst_8 = arith.constant dense<0.000000e+00> : vector<8x128xf32>
    %11 = tpu.matmul %9, %10, %cst_8 {dimension_numbers = #tpu.dot_dimension_numbers<[1], [0], [0], [1], [0, 0, 1, 1], [], []>} : vector<8x128xbf16>, vector<128x128xbf16>, vector<8x128xf32> -> vector<8x128xf32>
    %c0_9 = arith.constant 0 : index
    %c0_10 = arith.constant 0 : index
    %12 = vector.load %arg5[%c0_9, %c0_10] : memref<1x128xf32, #tpu.memory_space<vmem>>, vector<1x128xf32>
    %13 = vector.broadcast %12 : vector<1x128xf32> to vector<8x128xf32>
    %14 = arith.addf %11, %13 : vector<8x128xf32>
    %cst_11 = arith.constant 0.000000e+00 : f32
    %15 = vector.broadcast %cst_11 : f32 to vector<8x128xf32>
    %16 = arith.maximumf %14, %15 : vector<8x128xf32>
    %17 = arith.truncf %16 : vector<8x128xf32> to vector<8x128xbf16>
    %c0_12 = arith.constant 0 : index
    %c0_13 = arith.constant 0 : index
    %18 = vector.load %arg6[%c0_12, %c0_13] : memref<128x8xbf16, #tpu.memory_space<vmem>>, vector<128x8xbf16>
    %cst_14 = arith.constant dense<0.000000e+00> : vector<8x8xf32>
    %19 = tpu.matmul %17, %18, %cst_14 {dimension_numbers = #tpu.dot_dimension_numbers<[1], [0], [0], [1], [0, 0, 1, 1], [], []>} : vector<8x128xbf16>, vector<128x8xbf16>, vector<8x8xf32> -> vector<8x8xf32>
    %c0_15 = arith.constant 0 : index
    %c0_16 = arith.constant 0 : index
    %20 = vector.load %arg7[%c0_15, %c0_16] : memref<1x8xf32, #tpu.memory_space<vmem>>, vector<1x8xf32>
    %21 = vector.broadcast %20 : vector<1x8xf32> to vector<8x8xf32>
    %22 = arith.addf %19, %21 : vector<8x8xf32>
    %cst_17 = arith.constant 0.000000e+00 : f32
    %23 = vector.broadcast %cst_17 : f32 to vector<8x8xf32>
    %24 = arith.maximumf %22, %23 : vector<8x8xf32>
    %25 = vector.broadcast %cst_17 : f32 to vector<8x8xf32>
    %26 = arith.subf %22, %25 : vector<8x8xf32>
    %27 = arith.cmpf one, %26, %26 : vector<8x8xf32>
    %28 = vector.broadcast %cst_17 : f32 to vector<8x8xf32>
    %29 = arith.addf %22, %28 : vector<8x8xf32>
    %30 = math.absf %26 : vector<8x8xf32>
    %cst_18 = arith.constant 0.000000e+00 : f32
    %31 = vector.broadcast %cst_18 : f32 to vector<8x8xf32>
    %32 = arith.subf %31, %30 : vector<8x8xf32>
    %33 = math.exp %32 : vector<8x8xf32>
    %34 = math.log1p %33 : vector<8x8xf32>
    %35 = arith.addf %24, %34 : vector<8x8xf32>
    %36 = arith.select %27, %29, %35 : vector<8x8xi1>, vector<8x8xf32>
    %c0_19 = arith.constant 0 : index
    %c0_20 = arith.constant 0 : index
    %37 = vector.load %arg8[%c0_19, %c0_20] : memref<8x8xf32, #tpu.memory_space<vmem>>, vector<8x8xf32>
    tpu.vector_store %arg8[%c0_19, %c0_20], %36 {strides = array<i32>} : memref<8x8xf32, #tpu.memory_space<vmem>>, vector<8x8xf32>,
    return
  }
  func.func @transform_0(%arg0: i32) -> (i32, i32) {
    %c0_i32 = arith.constant 0 : i32
    %c0_i32_0 = arith.constant 0 : i32
    return %arg0, %c0_i32 : i32, i32
  }
  func.func @transform_1(%arg0: i32) -> (i32, i32) {
    %c0_i32 = arith.constant 0 : i32
    %c0_i32_0 = arith.constant 0 : i32
    %c0_i32_1 = arith.constant 0 : i32
    return %c0_i32, %c0_i32_0 : i32, i32
  }
  func.func @transform_2(%arg0: i32) -> (i32, i32) {
    %c0_i32 = arith.constant 0 : i32
    %c0_i32_0 = arith.constant 0 : i32
    %c0_i32_1 = arith.constant 0 : i32
    return %c0_i32, %c0_i32_0 : i32, i32
  }
  func.func @transform_3(%arg0: i32) -> (i32, i32) {
    %c0_i32 = arith.constant 0 : i32
    %c0_i32_0 = arith.constant 0 : i32
    %c0_i32_1 = arith.constant 0 : i32
    return %c0_i32, %c0_i32_0 : i32, i32
  }
  func.func @transform_4(%arg0: i32) -> (i32, i32) {
    %c0_i32 = arith.constant 0 : i32
    %c0_i32_0 = arith.constant 0 : i32
    %c0_i32_1 = arith.constant 0 : i32
    return %c0_i32, %c0_i32_0 : i32, i32
  }
  func.func @transform_5(%arg0: i32) -> (i32, i32) {
    %c0_i32 = arith.constant 0 : i32
    %c0_i32_0 = arith.constant 0 : i32
    %c0_i32_1 = arith.constant 0 : i32
    return %c0_i32, %c0_i32_0 : i32, i32
  }
  func.func @transform_6(%arg0: i32) -> (i32, i32) {
    %c0_i32 = arith.constant 0 : i32
    %c0_i32_0 = arith.constant 0 : i32
    %c0_i32_1 = arith.constant 0 : i32
    return %c0_i32, %c0_i32_0 : i32, i32
  }
  func.func @transform_7(%arg0: i32) -> (i32, i32) {
    %c0_i32 = arith.constant 0 : i32
    %c0_i32_0 = arith.constant 0 : i32
    return %arg0, %c0_i32 : i32, i32
  }
}

</mosaic_0001>

<bundles_post_ra>
// kernel: tpu_custom_call.1
= control target key start
LH: loop header
LB: loop body
LE: loop exit
PB: predicated region body
PF: predicated region fallthrough
CT: control target
= control target key end

     0   :  { %12 = vsyncpa [#allocation3], 0  ;;  %s693_s0 = inlined_call_operand.vmem [shape: f32[8,32], index: 0, kind: input, shape index: {}]   ;;  %s694_s1 = inlined_call_operand.hbm [shape: bf16[32,128], index: 1, kind: input, shape index: {}]   ;;  %s695_s2 = inlined_call_operand.vmem [shape: f32[1,128], index: 2, kind: input, shape index: {}]   ;;  %s696_s3 = inlined_call_operand.vmem [shape: bf16[128,128], index: 3, kind: input, shape index: {}]   ;;  %s697_s4 = inlined_call_operand.vmem [shape: f32[1,128], index: 4, kind: input, shape index: {}]   ;;  %s698_s5 = inlined_call_operand.vmem [shape: bf16[128,8], index: 5, kind: input, shape index: {}]   ;;  %s699_s6 = inlined_call_operand.vmem [shape: f32[1,8], index: 6, kind: input, shape index: {}]   ;;  %s700_s7 = inlined_call_operand.hbm [shape: f32[8,8], index: 7, kind: output, shape index: {}]  }
   0x1   :  { %13 = vsyncpa [#allocation4], 0  ;;  %s539_s24 = smov [#allocation2]   ;;  %s491_s28 = scalar_lea.hbm %s694_s1, 256 }
   0x2   :  { %s21_s25 = sshll.u32 %s539_s24, 4  ;;  %p492_p0 = scmp.ne.s32.totalorder %s694_s1, %s491_s28  ;;  %s22_s25 = int_to_ptr.vmem [resolvable:$true] %s21_s25 }
   0x3   :  { %p495_p1 = scmp.lt.u32.totalorder %s491_s28, %s694_s1 }
   0x5   :  { %p497_p2 = pnand %p495_p1, %p492_p0 }
   0x7   :  { %500 = shalt.err (!%p497_p2)
}
   0x8   :  { %s501_s10 = scalar_lea.vmem %s22_s25, 256  ;;  %p506_p4 = scmp.lt.s32.totalorder %s22_s25, %s22_s25 }
   0x9   :  { %p502_p3 = scmp.ne.s32.totalorder %s22_s25, %s501_s10  ;;  %p507_p5 = scmp.lt.s32.totalorder %s501_s10, %s501_s10 }
   0xb   :  { %p508_p6 = por %p507_p5, %p506_p4 }
   0xd   :  { %p509_p7 = pnand %p508_p6, %p502_p3 }
   0xf   :  { %512 = shalt.err (!%p509_p7)
}
  0x10   :  { %s540_s11 = smov 64   ;;  %s541_s12 = smov 4  }
  0x11   :  { %27 = dma.hbm_to_vmem [thread:$0]  %s694_s1, 256, %s22_s25, [#allocation3], %s540_s11, %s540_s11, %s541_s12  }
  0x12   :  { %535 = dma.done.wait [#allocation3], 256  }
  0x13   :  { %536 = vsyncadd [#allocation3], 4294967040  ;;  %v542_v0 = vmov 0.0   ;;  %vm543_vm0 = vmmov 0   ;;  %v469_v1 = vld [vmem:[#allocation2] sm:$0xff]   ;;  %v470_v2 = vld [vmem:[#allocation2 + $0x8] sm:$0xff]  }
  0x14   :  { %415 = vmatprep.subr.bf16.mxu0 %v542_v0  ;;  %419 = vmatprep.mubr.msk.bf16.mxu0 %vm543_vm0, %v542_v0  ;;  %v42_v3 = vld [vmem:[%s693_s0] sm:$0xff]  ;;  %v472_v6 = vld [vmem:[%s696_s3 + $0x8] sm:$0xff]   ;;  %vm67_vm1 = vcmask 261120   ;;  %v473_v7 = vld [vmem:[%s696_s3 + $0x10] sm:$0xff]   ;;  %vm355_vm3 = vcmask 64512  }
  0x15   :  { %423 = vmatprep.subr.bf16.mxu1 %v542_v0  ;;  %439 = vmatprep.mubr.msk.bf16.mxu1 %vm543_vm0, %v542_v0  ;;  %v471_v4 = vld [vmem:[%s696_s3] sm:$0xff]   ;;  %v43_v5 = vpack.c.bf16 %v42_v3, %v42_v3  ;;  %v474_v8 = vld [vmem:[%s696_s3 + $0x18] sm:$0xff]   ;;  %v476_v10 = vld [vmem:[%s696_s3 + $0x28] sm:$0xff]  }
  0x16   :  { %416 = vmatpush3.bf16.msra.mxu0 %v469_v1  ;;  %424 = vmatpush3.bf16.msra.mxu1 %v471_v4  ;;  %v475_v9 = vld [vmem:[%s696_s3 + $0x20] sm:$0xff]   ;;  %v477_v11 = vld [vmem:[%s696_s3 + $0x30] sm:$0xff]   ;;  %v478_v12 = vld [vmem:[%s696_s3 + $0x38] sm:$0xff]  }
  0x17   :  { %417 = vmatprep.subr.bf16.mxu0 %v542_v0  ;;  %425 = vmatprep.subr.bf16.mxu1 %v542_v0  ;;  %v479_v13 = vld [vmem:[%s698_s5] sm:$0xff]   ;;  %v480_v14 = vld [vmem:[%s698_s5 + $0x8] sm:$0xff]   ;;  %v481_v15 = vld [vmem:[%s698_s5 + $0x10] sm:$0xff]  }
  0x18   :  { %v482_v16 = vld [vmem:[%s698_s5 + $0x18] sm:$0xff]   ;;  %v483_v17 = vld [vmem:[%s698_s5 + $0x20] sm:$0xff]   ;;  %v484_v18 = vld [vmem:[%s698_s5 + $0x28] sm:$0xff]  }
  0x19   :  { %v372_v19 = vld [vmem:[%s695_s2] ss:$0 sm:$0xff]  ;;  %v485_v27 = vld [vmem:[%s698_s5 + $0x30] sm:$0xff]   ;;  %v486_v28 = vld [vmem:[%s698_s5 + $0x38] sm:$0xff]  }
  0x1a   :  { %418 = vmatpush3.bf16.msra.mxu0 %v470_v2  ;;  %426 = vmatpush3.bf16.msra.mxu1 %v472_v6  ;;  %v376_v29 = vld [vmem:[%s697_s4] ss:$0 sm:$0xff]  ;;  %s544_s4 = smov [#allocation5]  }
  0x1b   :  { %443 = vmatprep.subr.bf16.mxu0 %v542_v0  ;;  %427 = vmatprep.subr.bf16.mxu1 %v542_v0  ;;  %v385_v37 = vld [vmem:[%s699_s6] ss:$0 sm:$0xff]  ;;  %s363_s5 = sshll.u32 %s544_s4, 4  ;;  %s364_s5 = int_to_ptr.vmem [resolvable:$true] %s363_s5 }
  0x1c   :  { %s513_s6 = scalar_lea.vmem %s364_s5, 128  ;;  %p518_p9 = scmp.lt.s32.totalorder %s364_s5, %s364_s5 }
  0x1d   :  { %420 = vmatmul.mubr.msk.bf16.vlgmr.msra.gmra.mrb[0].mxu0 %vm67_vm1, %v43_v5  ;;  %p514_p8 = scmp.ne.s32.totalorder %s364_s5, %s513_s6  ;;  %p519_p10 = scmp.lt.s32.totalorder %s513_s6, %s513_s6 }
  0x1e   :  { %459 = vmatprep.mubr.msk.bf16.mxu0 %vm543_vm0, %v542_v0  ;;  %428 = vmatpush3.bf16.msra.mxu1 %v473_v7 }
  0x1f   :  { %429 = vmatprep.subr.bf16.mxu1 %v542_v0  ;;  %444 = vmatpush3.bf16.msra.mxu0 %v479_v13  ;;  %p520_p11 = por %p519_p10, %p518_p9 }
  0x20   :  { %445 = vmatprep.subr.bf16.mxu0 %v542_v0 }
  0x21   :  { %p521_p12 = pnand %p520_p11, %p514_p8 }
  0x22   :  { %430 = vmatpush3.bf16.msra.mxu1 %v474_v8 }
  0x23   :  { %431 = vmatprep.subr.bf16.mxu1 %v542_v0  ;;  %446 = vmatpush3.bf16.msra.mxu0 %v480_v14 }
  0x24   :  { %447 = vmatprep.subr.bf16.mxu0 %v542_v0 }
  0x26   :  { %432 = vmatpush3.bf16.msra.mxu1 %v475_v9 }
  0x27   :  { %433 = vmatprep.subr.bf16.mxu1 %v542_v0  ;;  %448 = vmatpush3.bf16.msra.mxu0 %v481_v15 }
  0x28   :  { %449 = vmatprep.subr.bf16.mxu0 %v542_v0 }
  0x2a   :  { %434 = vmatpush3.bf16.msra.mxu1 %v476_v10 }
  0x2b   :  { %435 = vmatprep.subr.bf16.mxu1 %v542_v0  ;;  %450 = vmatpush3.bf16.msra.mxu0 %v482_v16 }
  0x2c   :  { %451 = vmatprep.subr.bf16.mxu0 %v542_v0 }
  0x2e   :  { %436 = vmatpush3.bf16.msra.mxu1 %v477_v11 }
  0x2f   :  { %437 = vmatprep.subr.bf16.mxu1 %v542_v0  ;;  %452 = vmatpush3.bf16.msra.mxu0 %v483_v17 }
  0x30   :  { %453 = vmatprep.subr.bf16.mxu0 %v542_v0 }
  0x32   :  { %438 = vmatpush3.bf16.msra.mxu1 %v478_v12 }
  0x33   :  { %454 = vmatpush3.bf16.msra.mxu0 %v484_v18 }
  0x34   :  { %455 = vmatprep.subr.bf16.mxu0 %v542_v0 }
  0x37   :  { %456 = vmatpush3.bf16.msra.mxu0 %v485_v27 }
  0x38   :  { %457 = vmatprep.subr.bf16.mxu0 %v542_v0 }
  0x3b   :  { %458 = vmatpush3.bf16.msra.mxu0 %v486_v28 }
  0xf0   :  { %v105_v20 = vpop.f32.mrb[0].mxu0 }
  0xf1   :  { %v106_v21 = vadd.f32 %v372_v19, %v105_v20  ;;  %v421_v22 = vpop.f32.mrb[1].mxu0 }
  0xf2   :  { %v108_v23 = vpop.f32.mrb[2].mxu0 }
  0xf3   :  { %v111_v24 = vmax.f32 %v106_v21, 0.0  ;;  %v422_v25 = vpop.f32.mrb[3].mxu0 }
  0xf5   :  { %v112_v26 = vpack.c.bf16 %v111_v24, %v111_v24 }
  0xf7   :  { %440 = vmatmul.mubr.bf16.vlgmr.msra.gmra.mrb[0].mxu1 %v112_v26 }
 0x1ca   :  { %v218_v30 = vpop.f32.mrb[0].mxu1 }
 0x1cb   :  { %v219_v31 = vadd.f32 %v376_v29, %v218_v30  ;;  %v441_v32 = vpop.f32.mrb[1].mxu1 }
 0x1cc   :  { %v221_v33 = vpop.f32.mrb[2].mxu1 }
 0x1cd   :  { %v224_v34 = vmax.f32 %v219_v31, 0.0  ;;  %v442_v35 = vpop.f32.mrb[3].mxu1 }
 0x1cf   :  { %v225_v36 = vpack.c.bf16 %v224_v34, %v224_v34 }
 0x1d1   :  { %460 = vmatmul.mubr.bf16.vlgmr.msra.gmra.mrb[4].mxu0 %v225_v36 }
 0x2a4   :  { %v331_v38 = vpop.f32.mrb[4].mxu0 }
 0x2a5   :  { %v332_v39 = vadd.f32 %v385_v37, %v331_v38  ;;  %v461_v40 = vpop.f32.mrb[5].mxu0 }
 0x2a6   :  { %v334_v41 = vpop.f32.mrb[6].mxu0 }
 0x2a7   :  { %v340_v42 = vand.u32 2147483647, %v332_v39  ;;  %v462_v43 = vpop.f32.mrb[7].mxu0  ;;  %v337_v54 = vmax.f32 %v332_v39, 0.0  ;;  %vm338_vm4 = vcmp.ne.f32.partialorder %v332_v39, %v332_v39 }
 0x2a9   :  { %v341_v44 = vsub.f32 0.0, %v340_v42 }
 0x2ab   :  { %v342_v45 = vmul.f32 1.442695, %v341_v44 }
 0x2ad   :  { %487 = vpow2.f32 %v342_v45 }
 0x2b7   :  { %v488_v46 = vpop.eup %487 }
 0x2b8   :  { %v344_v47 = vadd.f32 1.0, %v488_v46  ;;  %v347_v48 = vmul.f32 -0.5, %v488_v46  ;;  %v350_v50 = vand.u32 2147483647, %v488_v46 }
 0x2ba   :  { %489 = vlog2.f32 %v344_v47  ;;  %v348_v49 = vadd.f32 1.0, %v347_v48  ;;  %vm351_vm2 = vcmp.lt.f32.partialorder %v350_v50, 0.0004427343 }
 0x2bc   :  { %v349_v53 = vmul.f32 %v488_v46, %v348_v49 }
 0x2c4   :  { %v490_v51 = vpop.eup %489 }
 0x2c5   :  { %v346_v52 = vmul.f32 0.6931472, %v490_v51 }
 0x2c7   :  { %v352_v55 = vsel %vm351_vm2, %v349_v53, %v346_v52 }
 0x2c8   :  { %v353_v56 = vadd.f32 %v352_v55, %v337_v54 }
 0x2ca   :  { %v354_v57 = vsel %vm338_vm4, %v332_v39, %v353_v56 }
 0x2cb   :  { %356 = vst.msk [vmem:[#allocation5] sm:$0xff] %vm355_vm3, %v354_v57 }
 0x2cc   :  { %524 = shalt.err (!%p521_p12)
}
 0x2cd   :  { %s525_s28 = scalar_lea.hbm %s700_s7, 128 }
 0x2ce   :  { %p526_p13 = scmp.ne.s32.totalorder %s700_s7, %s525_s28  ;;  %p529_p0 = scmp.lt.u32.totalorder %s525_s28, %s700_s7 }
 0x2d0   :  { %p531_p1 = pnand %p529_p0, %p526_p13 }
 0x2d2   :  { %534 = shalt.err (!%p531_p1)
}
 0x2d3   :  { %366 = dma.vmem_to_hbm [thread:$0]  %s364_s5, 128, %s700_s7, [#allocation4]  }
 0x2d4   :  { %537 = dma.done.wait [#allocation4], 128  }
 0x2d5   :  { %538 = vsyncadd [#allocation4], 4294967168 }
 0x2d6   :  { %370 = vsyncpa [#allocation3], 1 }
 0x2d7   :  { %371 = vsyncpa [#allocation4], 1 }

</bundles_post_ra>
